<compile_context>
chip_gen: v7x
topology: tpu7x:2x2x1
jax: 0.10.0
libtpu: 0.0.40
codegen_flags: <defaults>
</compile_context>

<pallas_src>
import jax
import jax.numpy as jnp
from jax.experimental import pallas as pl
from jax.experimental.pallas import tpu as pltpu


def _diag_kernel(x_ref, wselt_ref, wtr_ref, b_ref, o_ref):
    """One output tile of DiagLayer.forward.

    x_ref     : (A, D)      full x                    (constant index_map -> DMA'd once)
    wselt_ref : (4, D)      Wsel^T (chunk-summed W)   (constant index_map -> DMA'd once)
    wtr_ref   : (4, A, TN)  wtr[c, i, o] = W[o, 4*i+c]  (streamed / double-buffered)
    b_ref     : (1, TN)     bias tile
    o_ref     : (1, TN)     output tile
    """
    # gT[c, i] = sum_k Wsel[k, c] * x[i, k]  -- single "NT" MXU matmul, result (4, A).
    gT = jax.lax.dot_general(
        wselt_ref[...], x_ref[...],
        dimension_numbers=(((1,), (1,)), ((), ())),
        preferred_element_type=jnp.float32)

    # out[o] = b[o] + sum_{i,c} gT[c, i] * W[o, 4*i + c]
    #        = b[o] + sum_c (gT[c] @ wtr[c])[o]      -- 4 MXU matmuls of (1,A)x(A,TN).
    acc = b_ref[...].astype(jnp.float32)
    for c in range(4):
        acc = acc + jnp.dot(gT[c:c + 1, :], wtr_ref[c],
                            preferred_element_type=jnp.float32)
    o_ref[...] = acc.astype(o_ref.dtype)


def prepare_diag_params(weights, bias, *, param_dtype=jnp.float32):
    """Once-per-parameter-set preprocessing (hoisted off the per-call critical path).

    Returns (wselt, wtr, bias2d) with
      wselt[c, k]  = sum_{j in chunk c} weights[k, j]          (4, D)
      wtr[c, i, o] = weights[o, 4*i + c]                       (4, A, D)
      bias2d       = bias.reshape(1, D)  (float32)             (1, D)
    param_dtype=jnp.bfloat16 halves HBM bytes streamed per forward on v6e/v7x.
    """
    out_f, in_f = weights.shape
    assert in_f == out_f, "forward only shape-consistent for square weights"
    d = in_f
    assert d % 4 == 0
    a = d // 4
    n_per = d // 4
    wsel = weights.reshape(d, 4, n_per).sum(axis=2)            # (D, 4)
    wselt = wsel.T.astype(param_dtype)                         # (4, D)
    wtr = weights.T.reshape(a, 4, d).transpose(1, 0, 2)        # (4, A, D)
    wtr = wtr.astype(param_dtype)
    bias2d = bias.reshape(1, d).astype(jnp.float32)
    return wselt, wtr, bias2d


def diag_layer_forward(x, params, *, tile_n=256):
    """Pallas implementation of DiagLayer.forward given prepared params."""
    wselt, wtr, bias2d = params
    a, d = x.shape
    assert wtr.shape == (4, a, d) and a * 4 == d, (
        "x must be (in_features // 4, in_features)")

    x = x.astype(wtr.dtype)  # match the weight-stream dtype (f32 or bf16)

    # Output-tile width: multiple of 128 lanes that divides D (lane/MXU aligned;
    # 256 also matches the v6e/v7x 256x256 MXU).  Fall back to one tile otherwise.
    if d % 128 == 0 and tile_n % 128 == 0 and d % tile_n == 0 and d > tile_n:
        tn = tile_n
    else:
        tn = d
    grid = (d // tn,)

    return pl.pallas_call(
        _diag_kernel,
        out_shape=jax.ShapeDtypeStruct((1, d), jnp.float32),
        grid=grid,
        in_specs=[
            pl.BlockSpec((a, d), lambda j: (0, 0)),          # x: resident (one DMA)
            pl.BlockSpec((4, d), lambda j: (0, 0)),          # Wsel^T: resident
            pl.BlockSpec((4, a, tn), lambda j: (0, 0, j)),   # weight stream, pipelined
            pl.BlockSpec((1, tn), lambda j: (0, j)),         # bias tile
        ],
        out_specs=pl.BlockSpec((1, tn), lambda j: (0, j)),   # lane-dense output tile
        compiler_params=pltpu.CompilerParams(
            dimension_semantics=("parallel",)),              # v7x: shard tiles over 2 TCs
    )(x, wselt, wtr, bias2d)


def _ref_forward(x, weights, bias):
    """Pure-JAX emulation of the PyTorch forward (bmm read as matmul)."""
    mult = jnp.dot(x, weights, precision=jax.lax.Precision.HIGHEST)
    n_per = x.shape[1] // 4
    v = mult.reshape(-1, n_per).sum(axis=1)
    out = v.reshape(1, -1)
    return jnp.dot(out, weights.T, precision=jax.lax.Precision.HIGHEST) + bias


if __name__ == "__main__":
    D = 512          # in_features == out_features (128-aligned -> tiled grid of 2)
    A = D // 4       # number of x rows forced by the forward pass

    key = jax.random.PRNGKey(0)
    kx, kw, kb = jax.random.split(key, 3)
    x = jax.random.normal(kx, (A, D), dtype=jnp.float32)
    weights = jax.random.normal(kw, (D, D), dtype=jnp.float32)   # nn.init.normal_
    bias = jax.random.normal(kb, (D,), dtype=jnp.float32)        # see TODO(synk) above

    ref = _ref_forward(x, weights, bias)

    # float32 weight stream (keeps reference-level precision).
    params_f32 = prepare_diag_params(weights, bias)              # once per weight set
    out = jax.block_until_ready(diag_layer_forward(x, params_f32))
    assert out.shape == (1, D)
    assert jnp.allclose(out, ref, rtol=1e-2, atol=1e-2), (out, ref)

    # bfloat16 weight stream (half the HBM traffic on v6e/v7x; f32 accumulation).
    params_bf16 = prepare_diag_params(weights, bias, param_dtype=jnp.bfloat16)
    out_bf16 = jax.block_until_ready(diag_layer_forward(x, params_bf16))
    rel_err = jnp.max(jnp.abs(out_bf16 - ref)) / (jnp.max(jnp.abs(ref)) + 1e-6)
    assert out_bf16.shape == (1, D) and bool(rel_err < 5e-2), rel_err

    print("KERNEL_OK")
</pallas_src>

<mosaic_0001>
module attributes {stable_mosaic.version = 11 : i64} {
  func.func @_diag_kernel(%arg0: i32, %arg1: memref<128x512xf32, #tpu.memory_space<vmem>>, %arg2: memref<4x512xf32, #tpu.memory_space<vmem>>, %arg3: memref<4x128x256xf32, #tpu.memory_space<vmem>>, %arg4: memref<1x256xf32, #tpu.memory_space<vmem>>, %arg5: memref<1x256xf32, #tpu.memory_space<vmem>>) attributes {dimension_semantics = [#tpu.dimension_semantics<parallel>], iteration_bounds = array<i64: 2>, scalar_prefetch = 0 : i64, scratch_operands = 0 : i64, tpu.core_type = #tpu.core_type<tc>, window_params = [{pipeline_mode = #tpu.pipeline_mode<synchronous>, transform_indices = @transform_0, window_bounds = array<i64: 128, 512>}, {pipeline_mode = #tpu.pipeline_mode<synchronous>, transform_indices = @transform_1, window_bounds = array<i64: 4, 512>}, {transform_indices = @transform_2, window_bounds = array<i64: 4, 128, 256>}, {transform_indices = @transform_3, window_bounds = array<i64: 1, 256>}, {transform_indices = @transform_4, window_bounds = array<i64: 1, 256>}]} {
    %c0 = arith.constant 0 : index
    %c0_0 = arith.constant 0 : index
    %0 = vector.load %arg2[%c0, %c0_0] : memref<4x512xf32, #tpu.memory_space<vmem>>, vector<4x512xf32>
    %c0_1 = arith.constant 0 : index
    %c0_2 = arith.constant 0 : index
    %1 = vector.load %arg1[%c0_1, %c0_2] : memref<128x512xf32, #tpu.memory_space<vmem>>, vector<128x512xf32>
    %cst = arith.constant dense<0.000000e+00> : vector<4x128xf32>
    %2 = tpu.matmul %0, %1, %cst {dimension_numbers = #tpu.dot_dimension_numbers<[1], [1], [0], [0], [0, 0, 1, 0], [], []>} : vector<4x512xf32>, vector<128x512xf32>, vector<4x128xf32> -> vector<4x128xf32>
    %c0_3 = arith.constant 0 : index
    %c0_4 = arith.constant 0 : index
    %3 = vector.load %arg4[%c0_3, %c0_4] : memref<1x256xf32, #tpu.memory_space<vmem>>, vector<1x256xf32>
    %4 = vector.extract_strided_slice %2 {offsets = [0, 0], sizes = [1, 128], strides = [1, 1]} : vector<4x128xf32> to vector<1x128xf32>
    %c0_5 = arith.constant 0 : index
    %c0_6 = arith.constant 0 : index
    %c0_7 = arith.constant 0 : index
    %5 = vector.load %arg3[%c0_5, %c0_6, %c0_7] : memref<4x128x256xf32, #tpu.memory_space<vmem>>, vector<1x128x256xf32>
    %6 = vector.shape_cast %5 : vector<1x128x256xf32> to vector<128x256xf32>
    %cst_8 = arith.constant dense<0.000000e+00> : vector<1x256xf32>
    %7 = tpu.matmul %4, %6, %cst_8 {dimension_numbers = #tpu.dot_dimension_numbers<[1], [0], [0], [1], [0, 0, 1, 1], [], []>} : vector<1x128xf32>, vector<128x256xf32>, vector<1x256xf32> -> vector<1x256xf32>
    %8 = arith.addf %3, %7 : vector<1x256xf32>
    %9 = vector.extract_strided_slice %2 {offsets = [1, 0], sizes = [1, 128], strides = [1, 1]} : vector<4x128xf32> to vector<1x128xf32>
    %c1 = arith.constant 1 : index
    %c0_9 = arith.constant 0 : index
    %c0_10 = arith.constant 0 : index
    %10 = vector.load %arg3[%c1, %c0_9, %c0_10] : memref<4x128x256xf32, #tpu.memory_space<vmem>>, vector<1x128x256xf32>
    %11 = vector.shape_cast %10 : vector<1x128x256xf32> to vector<128x256xf32>
    %cst_11 = arith.constant dense<0.000000e+00> : vector<1x256xf32>
    %12 = tpu.matmul %9, %11, %cst_11 {dimension_numbers = #tpu.dot_dimension_numbers<[1], [0], [0], [1], [0, 0, 1, 1], [], []>} : vector<1x128xf32>, vector<128x256xf32>, vector<1x256xf32> -> vector<1x256xf32>
    %13 = arith.addf %8, %12 : vector<1x256xf32>
    %14 = vector.extract_strided_slice %2 {offsets = [2, 0], sizes = [1, 128], strides = [1, 1]} : vector<4x128xf32> to vector<1x128xf32>
    %c2 = arith.constant 2 : index
    %c0_12 = arith.constant 0 : index
    %c0_13 = arith.constant 0 : index
    %15 = vector.load %arg3[%c2, %c0_12, %c0_13] : memref<4x128x256xf32, #tpu.memory_space<vmem>>, vector<1x128x256xf32>
    %16 = vector.shape_cast %15 : vector<1x128x256xf32> to vector<128x256xf32>
    %cst_14 = arith.constant dense<0.000000e+00> : vector<1x256xf32>
    %17 = tpu.matmul %14, %16, %cst_14 {dimension_numbers = #tpu.dot_dimension_numbers<[1], [0], [0], [1], [0, 0, 1, 1], [], []>} : vector<1x128xf32>, vector<128x256xf32>, vector<1x256xf32> -> vector<1x256xf32>
    %18 = arith.addf %13, %17 : vector<1x256xf32>
    %19 = vector.extract_strided_slice %2 {offsets = [3, 0], sizes = [1, 128], strides = [1, 1]} : vector<4x128xf32> to vector<1x128xf32>
    %c3 = arith.constant 3 : index
    %c0_15 = arith.constant 0 : index
    %c0_16 = arith.constant 0 : index
    %20 = vector.load %arg3[%c3, %c0_15, %c0_16] : memref<4x128x256xf32, #tpu.memory_space<vmem>>, vector<1x128x256xf32>
    %21 = vector.shape_cast %20 : vector<1x128x256xf32> to vector<128x256xf32>
    %cst_17 = arith.constant dense<0.000000e+00> : vector<1x256xf32>
    %22 = tpu.matmul %19, %21, %cst_17 {dimension_numbers = #tpu.dot_dimension_numbers<[1], [0], [0], [1], [0, 0, 1, 1], [], []>} : vector<1x128xf32>, vector<128x256xf32>, vector<1x256xf32> -> vector<1x256xf32>
    %23 = arith.addf %18, %22 : vector<1x256xf32>
    %c0_18 = arith.constant 0 : index
    %c0_19 = arith.constant 0 : index
    %24 = vector.load %arg5[%c0_18, %c0_19] : memref<1x256xf32, #tpu.memory_space<vmem>>, vector<1x256xf32>
    tpu.vector_store %arg5[%c0_18, %c0_19], %23 {strides = array<i32>} : memref<1x256xf32, #tpu.memory_space<vmem>>, vector<1x256xf32>,
    return
  }
  func.func @transform_0(%arg0: i32) -> (i32, i32) {
    %c0_i32 = arith.constant 0 : i32
    %c0_i32_0 = arith.constant 0 : i32
    %c0_i32_1 = arith.constant 0 : i32
    return %c0_i32, %c0_i32_0 : i32, i32
  }
  func.func @transform_1(%arg0: i32) -> (i32, i32) {
    %c0_i32 = arith.constant 0 : i32
    %c0_i32_0 = arith.constant 0 : i32
    %c0_i32_1 = arith.constant 0 : i32
    return %c0_i32, %c0_i32_0 : i32, i32
  }
  func.func @transform_2(%arg0: i32) -> (i32, i32, i32) {
    %c0_i32 = arith.constant 0 : i32
    %c0_i32_0 = arith.constant 0 : i32
    %c0_i32_1 = arith.constant 0 : i32
    return %c0_i32, %c0_i32_0, %arg0 : i32, i32, i32
  }
  func.func @transform_3(%arg0: i32) -> (i32, i32) {
    %c0_i32 = arith.constant 0 : i32
    %c0_i32_0 = arith.constant 0 : i32
    return %c0_i32, %arg0 : i32, i32
  }
  func.func @transform_4(%arg0: i32) -> (i32, i32) {
    %c0_i32 = arith.constant 0 : i32
    %c0_i32_0 = arith.constant 0 : i32
    return %c0_i32, %arg0 : i32, i32
  }
}

</mosaic_0001>

<bundles_post_ra>
// kernel: tpu_custom_call.1
= control target key start
LH: loop header
LB: loop body
LE: loop exit
PB: predicated region body
PF: predicated region fallthrough
CT: control target
= control target key end

     0   :  { %9 = vsyncpa [#allocation3], 0  ;;  %s2056_s0 = inlined_call_operand.hbm [shape: f32[128,512], index: 0, kind: input, shape index: {}]   ;;  %s2057_s1 = inlined_call_operand.hbm [shape: f32[4,512], index: 1, kind: input, shape index: {}]   ;;  %s2058_s2 = inlined_call_operand.hbm [shape: f32[4,128,512], index: 2, kind: input, shape index: {}]   ;;  %s2059_s3 = inlined_call_operand.vmem [shape: f32[1,512], index: 3, kind: input, shape index: {}]   ;;  %s2060_s4 = inlined_call_operand.hbm [shape: f32[1,512], index: 4, kind: output, shape index: {}]  }
   0x1   :  { %10 = vsyncpa [#allocation6], 0 }
   0x2   :  { %11 = vsyncpa [#allocation4], 0 }
   0x3   :  { %13 = vsyncpa [#allocation4 + $0x1], 0  ;;  %s1674_s15 = smov 0   ;;  %s1676_s16 = smov 0  }
   0x4   :  { %s1678_s17 = smov 0   ;;  %s1680_s18 = smov 0  }
   0x5 LB: > { %s1695_s19 = sadd.s32 4294967295, %s1637_s18   ;;  %s1091_s20 = sadd.s32 4294967294, %s1637_s18   ;;  %s1637_s18 = sphi %s1680_s18, %s2088_s18   ;;  %s1633_s17 = sphi %s1678_s17, %s2087_s17   ;;  %s1629_s16 = sphi %s1676_s16, %s2086_s16   ;;  %s1625_s15 = sphi %s1674_s15, %s2085_s15  }
   0x6   : > { %s1699_s21 = sadd.s32 1, %s1637_s18   ;;  %s68_s22 = sadd.s32 1, %s1633_s17 }
   0x7   : > { %s65_s23 = ssub.s32 %s1637_s18, %s1699_s21  ;;  %p75_p0 = scmp.ne.s32.totalorder %s1633_s17, %s1629_s16 }
   0x8   : > { %p66_p1 = scmp.eq.s32.totalorder %s65_s23, 0  ;;  %p76_p2 = scmp.eq.s32.totalorder %s1637_s18, 0 }
   0x9   : > { %p81_p3 = scmp.ne.s32.totalorder %s1629_s16, %s1625_s15  ;;  %p2061_p4 = scmp.eq.s32.totalorder %s1695_s19, 0 }
   0xa   : > { %s1711_s24 = scalar_select %p66_p1, %s1633_s17, %s68_s22  }
   0xb   : > { %p1713_p5 = por %p76_p2, %p75_p0  ;;  %p1719_p6 = por %p2061_p4, %p81_p3 }
   0xc   : > { %p131_p7 = scmp.eq.s32.totalorder %s1695_s19, 1  ;;  %p137_p8 = scmp.eq.s32.totalorder %s1091_s20, 1 }
   0xd   : > { %s2066_s25 = scalar_select %p1713_p5, 1, 0 }
   0xe   : > { %s2067_s26 = scalar_select %p1719_p6, 1, 0 }
   0xf   : > { %p1092_p9 = scmp.ge.s32.totalorder %s1637_s18, 1  ;;  %p144_p10 = scmp.lt.s32.totalorder %s1637_s18, 3 }
  0x10   : > { %p1726_p11 = por %p131_p7, %p75_p0  ;;  %p1730_p12 = por %p137_p8, %p81_p3 }
  0x11   : > { %p1734_p13 = pnand %p1092_p9, %p144_p10  ;;  %s1639_s30 = smov [#allocation2]  }
  0x12   : > { %s2068_s27 = scalar_select %p1726_p11, 1, 0 }
  0x13   : > { %s2069_s28 = scalar_select %p1730_p12, 1, 0 }
  0x14   : > { %s2070_s29 = scalar_select %p1734_p13, 1, 0 }
  0x15   : > { %p1414_p1 = pneg %p1734_p13  ;;  %s156_s5 = sshll.u32 %s1639_s30, 4  ;;  %s157_s5 = int_to_ptr.vmem [resolvable:$true] %s156_s5 }
  0x16   : > { %s1640_s7 = smov [#allocation5]   ;;  %s1477_s11 = scalar_lea.hbm %s2056_s0, 8192 }
  0x17   : > { %p1742_p2 = pnand %p1414_p1, %p2061_p4  ;;  %s170_s8 = sshll.u32 %s1640_s7, 4  ;;  %s171_s8 = int_to_ptr.vmem [resolvable:$true] %s170_s8 }
  0x18   : > { %p1478_p7 = scmp.ne.s32.totalorder %s2056_s0, %s1477_s11  ;;  %p1484_p1 = scmp.lt.u32.totalorder %s1477_s11, %s2056_s0 }
  0x19   : > { %p1479_p8 = pneg %p1742_p2 }
  0x1b   : > { %p1480_p9 = pnand %p1479_p8, %p1478_p7 }
  0x1d   : > { %p1481_p10 = pneg %p1480_p9 }
  0x1f   : > { %p1486_p0 = pnand %p1484_p1, %p1481_p10 }
  0x21   : > { %1489 = shalt.err (!%p1486_p0)
}
  0x22   : > { %s1490_s22 = scalar_lea.vmem %s157_s5, 8192  ;;  %p1498_p11 = scmp.lt.s32.totalorder %s157_s5, %s157_s5 }
  0x23   : > { %p1491_p4 = scmp.ne.s32.totalorder %s157_s5, %s1490_s22  ;;  %p1499_p6 = scmp.lt.s32.totalorder %s1490_s22, %s1490_s22 }
  0x25   : > { %p1493_p3 = pnand %p1491_p4, %p1479_p8  ;;  %p1500_p13 = por %p1499_p6, %p1498_p11 }
  0x27   : > { %p1494_p12 = pneg %p1493_p3 }
  0x29   : > { %p1501_p5 = pnand %p1500_p13, %p1494_p12 }
  0x2b   : > { %1504 = shalt.err (!%p1501_p5)
}
  0x2c   : > { %s1641_s23 = smov 512   ;;  %s1642_s30 = smov 32  }
  0x2d   : > { %1417 = dma.hbm_to_vmem [thread:$0]  (!%p1742_p2), %s2056_s0, 8192, %s157_s5, [#allocation3], %s1641_s23, %s1641_s23, %s1642_s30  }
  0x2e   : > { %p2072_p4 = scmp.ne.s32.totalorder %s2066_s25, 0  ;;  %p2073_p0 = scmp.lt.s32.totalorder %s1637_s18, 2 }
  0x2f   : > { %s1505_s13 = scalar_lea.hbm %s2057_s1, 256 }
  0x30   : > { %p1776_p3 = pnand %p2073_p0, %p2072_p4  ;;  %p1506_p5 = scmp.ne.s32.totalorder %s2057_s1, %s1505_s13 }
  0x31   : > { %p1512_p12 = scmp.lt.u32.totalorder %s1505_s13, %s2057_s1 }
  0x32   : > { %s2074_s10 = scalar_select %p1776_p3, 1, 0 }
  0x33   : > { %p1508_p6 = pnand %p1506_p5, %p1479_p8 }
  0x35   : > { %p1509_p11 = pneg %p1508_p6 }
  0x37   : > { %p1514_p13 = pnand %p1512_p12, %p1509_p11 }
  0x39   : > { %1517 = shalt.err (!%p1514_p13)
}
  0x3a   : > { %s1518_s22 = scalar_lea.vmem %s171_s8, 256  ;;  %p1526_p1 = scmp.lt.s32.totalorder %s171_s8, %s171_s8 }
  0x3b   : > { %p1519_p7 = scmp.ne.s32.totalorder %s171_s8, %s1518_s22  ;;  %p1527_p4 = scmp.lt.s32.totalorder %s1518_s22, %s1518_s22 }
  0x3d   : > { %p1521_p9 = pnand %p1519_p7, %p1479_p8  ;;  %p1528_p0 = por %p1527_p4, %p1526_p1 }
  0x3f   : > { %p1522_p10 = pneg %p1521_p9 }
  0x41   : > { %p1529_p3 = pnand %p1528_p0, %p1522_p10 }
  0x43   : > { %1532 = shalt.err (!%p1529_p3)
}
  0x44   : > { %1420 = dma.hbm_to_vmem [thread:$0]  (!%p1742_p2), %s2057_s1, 256, %s171_s8, [#allocation6]  }
  0x45   : > { %s181_s9 = sand.u32 1, %s1637_s18   ;;  %s183_s11 = sand.u32 1, %s1633_s17  }
  0x46   : > { %s1096_s12 = sshll.u32 %s183_s11, 10  ;;  %s1206_s13 = sshll.u32 %s1637_s18, 8 }
  0x47   : > { %s1806_s5 = scalar_lea.hbm %s2058_s2, %s1206_s13  ;;  %s185_s6 = scalar_lea.vmem [#allocation7], %s1096_s12 }
  0x48   : > { %s192_s25 = sshll.u32 %s185_s6, 4  ;;  %s1810_s22 = scalar_lea.sflag [#allocation3], %s181_s9  ;;  %s1808_s25 = int_to_ptr.vmem [resolvable:$true] %s192_s25 }
  0x49   : > { %s1533_s8 = scalar_lea.hbm %s1806_s5, 16384  ;;  %p2075_p8 = scmp.ne.s32.totalorder %s2074_s10, 0 }
  0x4a   : > { %p1534_p2 = scmp.ne.s32.totalorder %s1806_s5, %s1533_s8  ;;  %s1538_s11 = scalar_lea.hbm %s2058_s2, 32768 }
  0x4b   : > { %p1535_p3 = pneg %p2075_p8  ;;  %p1539_p11 = scmp.lt.u32.totalorder %s1806_s5, %s2058_s2 }
  0x4c   : > { %p1540_p12 = scmp.lt.u32.totalorder %s1538_s11, %s1533_s8  ;;  %p1542_p7 = scmp.lt.u32.totalorder %s1533_s8, %s1806_s5 }
  0x4d   : > { %p1536_p5 = pnand %p1535_p3, %p1534_p2 }
  0x4e   : > { %p1541_p13 = por %p1540_p12, %p1539_p11 }
  0x4f   : > { %p1537_p6 = pneg %p1536_p5 }
  0x50   : > { %p1543_p9 = por %p1542_p7, %p1541_p13 }
  0x52   : > { %p1544_p10 = pnand %p1543_p9, %p1537_p6 }
  0x54   : > { %1547 = shalt.err (!%p1544_p10)
}
  0x55   : > { %s1548_s9 = scalar_lea.vmem %s1808_s25, 16384  ;;  %s1643_s12 = smov [#allocation7]  }
  0x56   : > { %p1549_p1 = scmp.ne.s32.totalorder %s1808_s25, %s1548_s9  ;;  %s1553_s20 = sshll.u32 %s1643_s12, 4  ;;  %s1554_s20 = int_to_ptr.vmem [resolvable:$false] %s1553_s20 }
  0x57   : > { %s1555_s6 = scalar_lea.vmem %s1554_s20, 32768  ;;  %p1556_p2 = scmp.lt.s32.totalorder %s1808_s25, %s1554_s20 }
  0x58   : > { %p1551_p4 = pnand %p1549_p1, %p1535_p3  ;;  %p1557_p5 = scmp.lt.s32.totalorder %s1555_s6, %s1548_s9 }
  0x5a   : > { %p1552_p0 = pneg %p1551_p4  ;;  %p1558_p11 = por %p1557_p5, %p1556_p2 }
  0x5c   : > { %p1559_p12 = pnand %p1558_p11, %p1552_p0 }
  0x5e   : > { %1562 = shalt.err (!%p1559_p12)
}
  0x5f   : > { %s1644_s8 = smov 256   ;;  %s1645_s30 = smov 16  }
  0x60   : > { %1424 = dma.hbm_to_vmem [thread:$0]  (!%p2075_p8), %s1806_s5, 16384, %s1808_s25, %s1810_s22, %s1641_s23, %s1644_s8, %s1645_s30  }
  0x61   : > { %p2076_p3 = scmp.ne.s32.totalorder %s2070_s29, 0 }
  0x62   : > { %p2077_p6 = scmp.eq.s32.totalorder (!%p2076_p3), %s1695_s19, 0 }
  0x63   : > { %212 = sbr.rel (%p2076_p3) target bundleno = 790 (0x316), region = 36 }
  0x6a   : > { %1608 = dma.done.wait (%p2077_p6), [#allocation3], 8192   ;;  %p2078_p13 = pmov %p2077_p6 }
  0x6b   : > { %p2079_p7 = pmov %p2077_p6 }
  0x6c   : > { %1610 = vsyncadd (%p2078_p13), [#allocation3], 4294959104 }
  0x6d   : > { %1612 = dma.done.wait (%p2079_p7), [#allocation6], 256   ;;  %p2080_p9 = pmov %p2077_p6 }
  0x6e   : > { %s222_s10 = sand.u32 1, %s1695_s19   ;;  %s1851_s23 = sand.u32 1, %s1629_s16  }
  0x6f   : > { %1614 = vsyncadd (%p2080_p9), [#allocation6], 4294967040  ;;  %s1102_s29 = sshll.u32 %s1851_s23, 10  ;;  %s223_s5 = scalar_lea.sflag [#allocation3], %s222_s10 }
  0x70   : > { %s1854_s25 = scalar_lea.vmem [#allocation7], %s1102_s29  ;;  %p2081_p8 = scmp.ne.s32.totalorder %s2067_s26, 0 }
  0x72   : > { %1616 = dma.done.wait (%p2081_p8), %s223_s5, 16384  }
  0x73   : > { %1618 = vsyncadd (%p2081_p8), %s223_s5, 4294950912  ;;  %v265_v0 = vld [vmem:[#allocation2 + $0x8] sm:$0xff]  ;;  %v264_v2 = vld [vmem:[#allocation2] sm:$0xff]  ;;  %s1104_s26 = sshll.u32 %s1695_s19, 1  ;;  %s1103_s13 = sshll.u32 %s1851_s23, 1 }
  0x74   : > { %v269_v1 = vld [vmem:[#allocation2 + $0x28] sm:$0xff]  ;;  %v268_v4 = vld [vmem:[#allocation2 + $0x20] sm:$0xff]  ;;  %v476_v27 = vld [vmem:[%s1854_s25 + $0x8] sm:$0xff]  ;;  %p257_p10 = scmp.lt.s32.totalorder %s1104_s26, 3  ;;  %s1207_s14 = sshll.u32 %s1695_s19, 5 }
  0x75   : > { %v1208_v3 = vpack.c.bf16 %v269_v1, %v265_v0  ;;  %v273_v5 = vld [vmem:[#allocation2 + $0x48] sm:$0xff]  ;;  %v1210_v7 = vpack.c.bf16 %v268_v4, %v264_v2  ;;  %v272_v9 = vld [vmem:[#allocation2 + $0x40] sm:$0xff]  ;;  %v475_v29 = vld [vmem:[%s1854_s25] sm:$0xff]  ;;  %s254_s9 = scalar_lea.vmem [#allocation8], %s1103_s13  ;;  %s2012_s8 = scalar_lea.hbm %s2060_s4, %s1207_s14 }
  0x76   : > { %v277_v6 = vld [vmem:[#allocation2 + $0x68] sm:$0xff]  ;;  %v276_v10 = vld [vmem:[#allocation2 + $0x60] sm:$0xff]  ;;  %v480_v32 = vld [vmem:[%s1854_s25 + $0x28] sm:$0xff]  ;;  %s2090_s26 = smov (!%p257_p10, %s1104_s26), 3  ;;  %s993_s12 = sshll.u32 %s254_s9, 4  ;;  %s2014_s12 = int_to_ptr.vmem [resolvable:$true] %s993_s12 }
  0x77   : > { %v1212_v8 = vpack.c.bf16 %v277_v6, %v273_v5  ;;  %1209 = vmatprep.subr.bf16.mxu0 %v1208_v3  ;;  %v281_v11 = vld [vmem:[#allocation2 + $0x88] sm:$0xff]  ;;  %v1214_v13 = vpack.c.bf16 %v276_v10, %v272_v9  ;;  %v1860_v15 = vld [vmem:[#allocation5] sm:$0xff]  ;;  %v479_v37 = vld [vmem:[%s1854_s25 + $0x20] sm:$0xff]  ;;  %s259_s11 = scalar_lea.vmem %s2059_s3, %s2090_s26  ;;  %s979_s30 = scalar_lea.sflag [#allocation4], %s1851_s23 }
  0x78   : > { %1211 = vmatpush1.bf16.xpose.msra.mxu0 %v1210_v7  ;;  %v285_v12 = vld [vmem:[#allocation2 + $0xa8] sm:$0xff]  ;;  %v330_v16 = vcombine.high %v1860_v15, %v1860_v15  ;;  %v280_v17 = vld [vmem:[#allocation2 + $0x80] sm:$0xff]  ;;  %v484_v39 = vld [vmem:[%s1854_s25 + $0x48] sm:$0xff]  ;;  %s1563_s10 = scalar_lea.vmem %s2014_s12, 32  ;;  %p2082_p4 = scmp.ne.s32.totalorder %s2068_s27, 0 }
  0x79   : > { %1213 = vmatprep.subr.bf16.mxu0 %v1212_v8  ;;  %v1216_v14 = vpack.c.bf16 %v285_v12, %v281_v11  ;;  %v284_v18 = vld [vmem:[#allocation2 + $0xa0] sm:$0xff]  ;;  %v289_v19 = vld [vmem:[#allocation2 + $0xc8] sm:$0xff]  ;;  %v483_v44 = vld [vmem:[%s1854_s25 + $0x40] sm:$0xff]  ;;  %p1564_p1 = scmp.ne.s32.totalorder %s2014_s12, %s1563_s10  ;;  %s1648_s19 = smov [#allocation8]  }
  0x7a   : > { %398 = vmatprep.mubr.f32.mxu0 %v330_v16  ;;  %v293_v20 = vld [vmem:[#allocation2 + $0xe8] sm:$0xff]  ;;  %v1218_v21 = vpack.c.bf16 %v284_v18, %v280_v17  ;;  %v288_v23 = vld [vmem:[#allocation2 + $0xc0] sm:$0xff]  ;;  %v488_v46 = vld [vmem:[%s1854_s25 + $0x68] sm:$0xff]  ;;  %s1567_s29 = sshll.u32 %s1648_s19, 4  ;;  %s1568_s29 = int_to_ptr.vmem [resolvable:$false] %s1567_s29 }
  0x7b   : > { %v1220_v22 = vpack.c.bf16 %v293_v20, %v289_v19  ;;  %v292_v24 = vld [vmem:[#allocation2 + $0xe0] sm:$0xff]  ;;  %v297_v25 = vld [vmem:[#allocation2 + $0x108] sm:$0xff]  ;;  %v487_v54 = vld [vmem:[%s1854_s25 + $0x60] sm:$0xff]  ;;  %p1565_p0 = pnand %p1564_p1, %p2082_p4  ;;  %s1569_s5 = scalar_lea.vmem %s1568_s29, 64 }
  0x7c   : > { %v301_v26 = vld [vmem:[#allocation2 + $0x128] sm:$0xff]  ;;  %v477_v31 = vld [vmem:[%s1854_s25 + $0x10] sm:$0xff]  ;;  %v1222_v34 = vpack.c.bf16 %v292_v24, %v288_v23  ;;  %v492_v57 = vld [vmem:[%s1854_s25 + $0x88] sm:$0xff]  ;;  %p1570_p5 = scmp.lt.s32.totalorder %s2014_s12, %s1568_s29  ;;  %p1571_p11 = scmp.lt.s32.totalorder %s1569_s5, %s1563_s10 }
  0x7d   : > { %v478_v28 = vld [vmem:[%s1854_s25 + $0x18] sm:$0xff]  ;;  %v1274_v35 = vpack.c.bf16 %v477_v31, %v475_v29  ;;  %v481_v38 = vld [vmem:[%s1854_s25 + $0x30] sm:$0xff]  ;;  %v1224_v40 = vpack.c.bf16 %v301_v26, %v297_v25  ;;  %v491_v62 = vld [vmem:[%s1854_s25 + $0x80] sm:$0xff]  ;;  %p1566_p2 = pneg %p1565_p0 }
  0x7e   : > { %v1272_v30 = vpack.c.bf16 %v478_v28, %v476_v27  ;;  %v482_v33 = vld [vmem:[%s1854_s25 + $0x38] sm:$0xff]  ;;  %v1278_v42 = vpack.c.bf16 %v481_v38, %v479_v37  ;;  %v485_v45 = vld [vmem:[%s1854_s25 + $0x50] sm:$0xff]  ;;  %v496_v0 = vld [vmem:[%s1854_s25 + $0xa8] sm:$0xff]  ;;  %p1572_p12 = por %p1571_p11, %p1570_p5 }
  0x7f   : > { %v1276_v36 = vpack.c.bf16 %v482_v33, %v480_v32  ;;  %v486_v41 = vld [vmem:[%s1854_s25 + $0x58] sm:$0xff]  ;;  %v296_v48 = vld [vmem:[#allocation2 + $0x100] sm:$0xff]  ;;  %v1282_v52 = vpack.c.bf16 %v485_v45, %v483_v44  ;;  %v495_v8 = vld [vmem:[%s1854_s25 + $0xa0] sm:$0xff] }
  0x80   : > { %1215 = vmatpush1.bf16.xpose.msra.mxu0 %v1214_v13  ;;  %1273 = vmatprep.subr.bf16.mxu1 %v1272_v30  ;;  %v1280_v43 = vpack.c.bf16 %v486_v41, %v484_v39  ;;  %v490_v47 = vld [vmem:[%s1854_s25 + $0x78] sm:$0xff]  ;;  %v300_v49 = vld [vmem:[#allocation2 + $0x120] sm:$0xff]  ;;  %v500_v11 = vld [vmem:[%s1854_s25 + $0xc8] sm:$0xff]  ;;  %p1573_p3 = pnand %p1572_p12, %p1566_p2 }
  0x81   : > { %1217 = vmatprep.subr.bf16.mxu0 %v1216_v14  ;;  %1275 = vmatpush1.bf16.msra.mxu1 %v1274_v35  ;;  %v305_v50 = vld [vmem:[#allocation2 + $0x148] sm:$0xff]  ;;  %v1284_v53 = vpack.c.bf16 %v490_v47, %v488_v46  ;;  %v489_v55 = vld [vmem:[%s1854_s25 + $0x70] sm:$0xff]  ;;  %v1226_v56 = vpack.c.bf16 %v300_v49, %v296_v48  ;;  %v499_v17 = vld [vmem:[%s1854_s25 + $0xc0] sm:$0xff] }
  0x82   : > { %1277 = vmatprep.subr.bf16.mxu1 %v1276_v36  ;;  %v309_v51 = vld [vmem:[#allocation2 + $0x168] sm:$0xff]  ;;  %v1286_v60 = vpack.c.bf16 %v489_v55, %v487_v54  ;;  %v493_v63 = vld [vmem:[%s1854_s25 + $0x90] sm:$0xff]  ;;  %v504_v19 = vld [vmem:[%s1854_s25 + $0xe8] sm:$0xff] }
  0x83   : > { %v494_v58 = vld [vmem:[%s1854_s25 + $0x98] sm:$0xff]  ;;  %v1228_v59 = vpack.c.bf16 %v309_v51, %v305_v50  ;;  %v304_v2 = vld [vmem:[#allocation2 + $0x140] sm:$0xff]  ;;  %v1290_v6 = vpack.c.bf16 %v493_v63, %v491_v62  ;;  %v503_v27 = vld [vmem:[%s1854_s25 + $0xe0] sm:$0xff] }
  0x84   : > { %v1288_v61 = vpack.c.bf16 %v494_v58, %v492_v57  ;;  %v498_v1 = vld [vmem:[%s1854_s25 + $0xb8] sm:$0xff]  ;;  %v308_v3 = vld [vmem:[#allocation2 + $0x160] sm:$0xff]  ;;  %v271_v35 = vld [vmem:[#allocation2 + $0x38] sm:$0xff] }
  0x85   : > { %1279 = vmatpush1.bf16.msra.mxu1 %v1278_v42  ;;  %v313_v4 = vld [vmem:[#allocation2 + $0x188] sm:$0xff]  ;;  %v1292_v7 = vpack.c.bf16 %v498_v1, %v496_v0  ;;  %v497_v9 = vld [vmem:[%s1854_s25 + $0xb0] sm:$0xff]  ;;  %v1230_v10 = vpack.c.bf16 %v308_v3, %v304_v2  ;;  %v266_v38 = vld [vmem:[#allocation2 + $0x10] sm:$0xff] }
  0x86   : > { %1281 = vmatprep.subr.bf16.mxu1 %v1280_v43  ;;  %v317_v5 = vld [vmem:[#allocation2 + $0x1a8] sm:$0xff]  ;;  %v1294_v14 = vpack.c.bf16 %v497_v9, %v495_v8  ;;  %v501_v18 = vld [vmem:[%s1854_s25 + $0xd0] sm:$0xff]  ;;  %v270_v39 = vld [vmem:[#allocation2 + $0x30] sm:$0xff] }
  0x87   : > { %v502_v12 = vld [vmem:[%s1854_s25 + $0xd8] sm:$0xff]  ;;  %v1232_v13 = vpack.c.bf16 %v317_v5, %v313_v4  ;;  %v1298_v25 = vpack.c.bf16 %v501_v18, %v499_v17  ;;  %v505_v28 = vld [vmem:[%s1854_s25 + $0xf0] sm:$0xff]  ;;  %v275_v41 = vld [vmem:[#allocation2 + $0x58] sm:$0xff]  ;;  %v1242_v43 = vpack.c.bf16 %v270_v39, %v266_v38 }
  0x88   : > { %1219 = vmatpush1.bf16.xpose.msra.mxu0 %v1218_v21  ;;  %v1296_v16 = vpack.c.bf16 %v502_v12, %v500_v11  ;;  %v506_v20 = vld [vmem:[%s1854_s25 + $0xf8] sm:$0xff]  ;;  %v312_v21 = vld [vmem:[#allocation2 + $0x180] sm:$0xff]  ;;  %v1302_v31 = vpack.c.bf16 %v505_v28, %v503_v27  ;;  %v279_v42 = vld [vmem:[#allocation2 + $0x78] sm:$0xff] }
  0x89   : > { %1221 = vmatprep.subr.bf16.mxu0 %v1220_v22  ;;  %1283 = vmatpush1.bf16.msra.mxu1 %v1282_v52  ;;  %v316_v22 = vld [vmem:[#allocation2 + $0x1a0] sm:$0xff]  ;;  %v321_v23 = vld [vmem:[#allocation2 + $0x1c8] sm:$0xff]  ;;  %v1300_v26 = vpack.c.bf16 %v506_v20, %v504_v19  ;;  %v1244_v45 = vpack.c.bf16 %v279_v42, %v275_v41  ;;  %v274_v46 = vld [vmem:[#allocation2 + $0x50] sm:$0xff] }
  0x8a   : > { %1285 = vmatprep.subr.bf16.mxu1 %v1284_v53  ;;  %v325_v24 = vld [vmem:[#allocation2 + $0x1e8] sm:$0xff]  ;;  %v1234_v29 = vpack.c.bf16 %v316_v22, %v312_v21  ;;  %v320_v32 = vld [vmem:[#allocation2 + $0x1c0] sm:$0xff]  ;;  %v278_v47 = vld [vmem:[#allocation2 + $0x70] sm:$0xff] }
  0x8b   : > { %v1236_v30 = vpack.c.bf16 %v325_v24, %v321_v23  ;;  %v324_v33 = vld [vmem:[#allocation2 + $0x1e0] sm:$0xff]  ;;  %v283_v48 = vld [vmem:[#allocation2 + $0x98] sm:$0xff]  ;;  %v1246_v50 = vpack.c.bf16 %v278_v47, %v274_v46  ;;  %v282_v52 = vld [vmem:[#allocation2 + $0x90] sm:$0xff]  ;;  %v1646_v24 = vmov 0.0  }
  0x8c   : > { %v1238_v36 = vpack.c.bf16 %v324_v33, %v320_v32  ;;  %v287_v49 = vld [vmem:[#allocation2 + $0xb8] sm:$0xff]  ;;  %v286_v53 = vld [vmem:[#allocation2 + $0xb0] sm:$0xff]  ;;  %v1108_v22 = vld [vmem:[%s1854_s25 + $0x118] sm:$0xff]  ;;  %571 = vmatprep.mubr.f32.mxu1 %v1646_v24 }
  0x8d   : > { %1287 = vmatpush1.bf16.msra.mxu1 %v1286_v60  ;;  %v1248_v51 = vpack.c.bf16 %v287_v49, %v283_v48  ;;  %v291_v54 = vld [vmem:[#allocation2 + $0xd8] sm:$0xff]  ;;  %v294_v58 = vld [vmem:[#allocation2 + $0xf0] sm:$0xff]  ;;  %v1112_v28 = vld [vmem:[%s1854_s25 + $0x138] sm:$0xff] }
  0x8e   : > { %1289 = vmatprep.subr.bf16.mxu1 %v1288_v61  ;;  %v295_v55 = vld [vmem:[#allocation2 + $0xf8] sm:$0xff]  ;;  %v298_v63 = vld [vmem:[#allocation2 + $0x110] sm:$0xff]  ;;  %v1111_v32 = vld [vmem:[%s1854_s25 + $0x130] sm:$0xff] }
  0x8f   : > { %v1252_v57 = vpack.c.bf16 %v295_v55, %v291_v54  ;;  %v303_v60 = vld [vmem:[#allocation2 + $0x138] sm:$0xff]  ;;  %v302_v0 = vld [vmem:[#allocation2 + $0x130] sm:$0xff]  ;;  %v1120_v42 = vld [vmem:[%s1854_s25 + $0x178] sm:$0xff] }
  0x90   : > { %1223 = vmatpush1.bf16.xpose.msra.mxu0 %v1222_v34  ;;  %v267_v34 = vld [vmem:[#allocation2 + $0x18] sm:$0xff]  ;;  %v1258_v3 = vpack.c.bf16 %v302_v0, %v298_v63  ;;  %v306_v5 = vld [vmem:[#allocation2 + $0x150] sm:$0xff]  ;;  %v1119_v46 = vld [vmem:[%s1854_s25 + $0x170] sm:$0xff] }
  0x91   : > { %1225 = vmatprep.subr.bf16.mxu0 %v1224_v40  ;;  %1291 = vmatpush1.bf16.msra.mxu1 %v1290_v6  ;;  %v1240_v37 = vpack.c.bf16 %v271_v35, %v267_v34  ;;  %v263_v40 = vld [vmem:[#allocation5 + $0x8] sm:$0xff]  ;;  %v307_v1 = vld [vmem:[#allocation2 + $0x158] sm:$0xff]  ;;  %v310_v6 = vld [vmem:[#allocation2 + $0x170] sm:$0xff] }
  0x92   : > { %1293 = vmatprep.subr.bf16.mxu1 %v1292_v7  ;;  %v331_v44 = vcombine.high %v263_v40, %v263_v40  ;;  %v311_v2 = vld [vmem:[#allocation2 + $0x178] sm:$0xff]  ;;  %v1262_v9 = vpack.c.bf16 %v310_v6, %v306_v5  ;;  %v314_v11 = vld [vmem:[#allocation2 + $0x190] sm:$0xff]  ;;  %v1116_v35 = vld [vmem:[%s1854_s25 + $0x158] sm:$0xff] }
  0x93   : > { %v1260_v4 = vpack.c.bf16 %v311_v2, %v307_v1  ;;  %v315_v7 = vld [vmem:[#allocation2 + $0x198] sm:$0xff]  ;;  %v318_v12 = vld [vmem:[#allocation2 + $0x1b0] sm:$0xff]  ;;  %v1124_v48 = vld [vmem:[%s1854_s25 + $0x198] sm:$0xff] }
  0x94   : > { %v319_v8 = vld [vmem:[#allocation2 + $0x1b8] sm:$0xff]  ;;  %v322_v18 = vld [vmem:[#allocation2 + $0x1d0] sm:$0xff]  ;;  %v1128_v54 = vld [vmem:[%s1854_s25 + $0x1b8] sm:$0xff] }
  0x95   : > { %1295 = vmatpush1.bf16.msra.mxu1 %v1294_v14  ;;  %v327_v14 = vld [vmem:[#allocation2 + $0x1f8] sm:$0xff]  ;;  %v326_v19 = vld [vmem:[#allocation2 + $0x1f0] sm:$0xff]  ;;  %v1131_v63 = vld [vmem:[%s1854_s25 + $0x1d0] sm:$0xff] }
  0x96   : > { %1297 = vmatprep.subr.bf16.mxu1 %v1296_v16  ;;  %v1266_v16 = vpack.c.bf16 %v318_v12, %v314_v11  ;;  %v1270_v20 = vpack.c.bf16 %v326_v19, %v322_v18  ;;  %v1106_v21 = vld [vmem:[%s1854_s25 + $0x108] sm:$0xff]  ;;  %v1113_v39 = vld [vmem:[%s1854_s25 + $0x140] sm:$0xff]  ;;  %v1136_v1 = vld [vmem:[%s1854_s25 + $0x1f8] sm:$0xff] }
  0x97   : > { %v1304_v23 = vpack.c.bf16 %v1108_v22, %v1106_v21  ;;  %v1110_v27 = vld [vmem:[%s1854_s25 + $0x128] sm:$0xff]  ;;  %v1135_v5 = vld [vmem:[%s1854_s25 + $0x1f0] sm:$0xff]  ;;  %v1141_v18 = vld [vmem:[%s1854_s25 + $0x220] sm:$0xff] }
  0x98   : > { %1227 = vmatpush1.bf16.xpose.msra.mxu0 %v1226_v56  ;;  %v1250_v56 = vpack.c.bf16 %v286_v53, %v282_v52  ;;  %v1114_v34 = vld [vmem:[%s1854_s25 + $0x148] sm:$0xff]  ;;  %v1123_v52 = vld [vmem:[%s1854_s25 + $0x190] sm:$0xff]  ;;  %v1148_v21 = vld [vmem:[%s1854_s25 + $0x258] sm:$0xff] }
  0x99   : > { %1229 = vmatprep.subr.bf16.mxu0 %v1228_v59  ;;  %1299 = vmatpush1.bf16.msra.mxu1 %v1298_v25  ;;  %v299_v59 = vld [vmem:[#allocation2 + $0x118] sm:$0xff]  ;;  %v1105_v25 = vld [vmem:[%s1854_s25 + $0x100] sm:$0xff]  ;;  %v1312_v38 = vpack.c.bf16 %v1116_v35, %v1114_v34  ;;  %v1139_v11 = vld [vmem:[%s1854_s25 + $0x210] sm:$0xff] }
  0x9a   : > { %1301 = vmatprep.subr.bf16.mxu1 %v1300_v26  ;;  %v1256_v62 = vpack.c.bf16 %v303_v60, %v299_v59  ;;  %v1107_v26 = vld [vmem:[%s1854_s25 + $0x110] sm:$0xff]  ;;  %v1118_v41 = vld [vmem:[%s1854_s25 + $0x168] sm:$0xff]  ;;  %v1132_v59 = vld [vmem:[%s1854_s25 + $0x1d8] sm:$0xff] }
  0x9b   : > { %v1122_v47 = vld [vmem:[%s1854_s25 + $0x188] sm:$0xff]  ;;  %v1143_v19 = vld [vmem:[%s1854_s25 + $0x230] sm:$0xff]  ;;  %v1156_v35 = vld [vmem:[%s1854_s25 + $0x298] sm:$0xff] }
  0x9c   : > { %v1126_v53 = vld [vmem:[%s1854_s25 + $0x1a8] sm:$0xff]  ;;  %v1342_v22 = vpack.c.bf16 %v1143_v19, %v1141_v18  ;;  %v1183_v18 = vld [vmem:[%s1854_s25 + $0x370] sm:$0xff] }
  0x9d   : > { %1303 = vmatpush1.bf16.msra.mxu1 %v1302_v31  ;;  %v1109_v31 = vld [vmem:[%s1854_s25 + $0x120] sm:$0xff]  ;;  %v1134_v0 = vld [vmem:[%s1854_s25 + $0x1e8] sm:$0xff] }
  0x9e   : > { %1305 = vmatprep.subr.bf16.mxu1 %v1304_v23  ;;  %v1138_v6 = vld [vmem:[%s1854_s25 + $0x208] sm:$0xff] }
  0x9f   : > { %v1142_v12 = vld [vmem:[%s1854_s25 + $0x228] sm:$0xff] }
  0xa0   : > { %1231 = vmatpush1.bf16.xpose.msra.mxu0 %v1230_v10  ;;  %v1264_v10 = vpack.c.bf16 %v319_v8, %v315_v7  ;;  %v1140_v7 = vld [vmem:[%s1854_s25 + $0x218] sm:$0xff]  ;;  %v1154_v34 = vld [vmem:[%s1854_s25 + $0x288] sm:$0xff] }
  0xa1   : > { %1233 = vmatprep.subr.bf16.mxu0 %v1232_v13  ;;  %v323_v13 = vld [vmem:[#allocation2 + $0x1d8] sm:$0xff] }
  0xa2   : > { %v1268_v17 = vpack.c.bf16 %v327_v14, %v323_v13  ;;  %v1144_v13 = vld [vmem:[%s1854_s25 + $0x238] sm:$0xff]  ;;  %v1186_v19 = vld [vmem:[%s1854_s25 + $0x388] sm:$0xff] }
  0xa8   : > { %1235 = vmatpush1.bf16.xpose.msra.mxu0 %v1234_v29  ;;  %v1306_v29 = vpack.c.bf16 %v1107_v26, %v1105_v25  ;;  %v1145_v25 = vld [vmem:[%s1854_s25 + $0x240] sm:$0xff]  ;;  %v1147_v26 = vld [vmem:[%s1854_s25 + $0x250] sm:$0xff] }
  0xa9   : > { %1237 = vmatprep.subr.bf16.mxu0 %v1236_v30  ;;  %v1308_v30 = vpack.c.bf16 %v1112_v28, %v1110_v27  ;;  %v1150_v27 = vld [vmem:[%s1854_s25 + $0x268] sm:$0xff]  ;;  %v1152_v28 = vld [vmem:[%s1854_s25 + $0x278] sm:$0xff] }
  0xb0   : > { %1239 = vmatpush1.bf16.xpose.msra.mxu0 %v1238_v36 }
  0xb1   : > { %1241 = vmatprep.subr.bf16.mxu0 %v1240_v37  ;;  %v1310_v37 = vpack.c.bf16 %v1111_v32, %v1109_v31  ;;  %v1149_v31 = vld [vmem:[%s1854_s25 + $0x260] sm:$0xff]  ;;  %v1151_v32 = vld [vmem:[%s1854_s25 + $0x270] sm:$0xff] }
  0xb7   : > { %399 = vmatmul.mubr.f32.vlgmr.msra.gmra.mrb[0].mxu0 %v1860_v15  ;;  %v290_v15 = vld [vmem:[#allocation2 + $0xd0] sm:$0xff] }
  0xb8   : > { %1243 = vmatpush1.bf16.xpose.msra.mxu0 %v1242_v43  ;;  %468 = vmatprep.mubr.f32.mxu0 %v331_v44  ;;  %v1254_v61 = vpack.c.bf16 %v294_v58, %v290_v15  ;;  %v1316_v44 = vpack.c.bf16 %v1120_v42, %v1118_v41  ;;  %v1127_v15 = vld [vmem:[%s1854_s25 + $0x1b0] sm:$0xff]  ;;  %v1130_v58 = vld [vmem:[%s1854_s25 + $0x1c8] sm:$0xff]  ;;  %v1160_v41 = vld [vmem:[%s1854_s25 + $0x2b8] sm:$0xff] }
  0xb9   : > { %1245 = vmatprep.subr.bf16.mxu0 %v1244_v45  ;;  %v1117_v45 = vld [vmem:[%s1854_s25 + $0x160] sm:$0xff] }
  0xba   : > { %v1318_v49 = vpack.c.bf16 %v1119_v46, %v1117_v45  ;;  %v1159_v45 = vld [vmem:[%s1854_s25 + $0x2b0] sm:$0xff]  ;;  %v1162_v46 = vld [vmem:[%s1854_s25 + $0x2c8] sm:$0xff] }
  0xc0   : > { %1247 = vmatpush1.bf16.xpose.msra.mxu0 %v1246_v50  ;;  %v1320_v50 = vpack.c.bf16 %v1124_v48, %v1122_v47  ;;  %v1164_v47 = vld [vmem:[%s1854_s25 + $0x2d8] sm:$0xff] }
  0xc1   : > { %1249 = vmatprep.subr.bf16.mxu0 %v1248_v51  ;;  %v1121_v51 = vld [vmem:[%s1854_s25 + $0x180] sm:$0xff] }
  0xc2   : > { %v1322_v55 = vpack.c.bf16 %v1123_v52, %v1121_v51  ;;  %v1163_v51 = vld [vmem:[%s1854_s25 + $0x2d0] sm:$0xff]  ;;  %v1166_v52 = vld [vmem:[%s1854_s25 + $0x2e8] sm:$0xff] }
  0xc8   : > { %1251 = vmatpush1.bf16.xpose.msra.mxu0 %v1250_v56  ;;  %v1324_v56 = vpack.c.bf16 %v1128_v54, %v1126_v53  ;;  %v1168_v53 = vld [vmem:[%s1854_s25 + $0x2f8] sm:$0xff] }
  0xc9   : > { %1253 = vmatprep.subr.bf16.mxu0 %v1252_v57  ;;  %v1125_v57 = vld [vmem:[%s1854_s25 + $0x1a0] sm:$0xff] }
  0xca   : > { %v1326_v60 = vpack.c.bf16 %v1127_v15, %v1125_v57  ;;  %v1167_v57 = vld [vmem:[%s1854_s25 + $0x2f0] sm:$0xff]  ;;  %v1170_v15 = vld [vmem:[%s1854_s25 + $0x308] sm:$0xff] }
  0xd0   : > { %1255 = vmatpush1.bf16.xpose.msra.mxu0 %v1254_v61  ;;  %v1328_v61 = vpack.c.bf16 %v1132_v59, %v1130_v58  ;;  %v1172_v58 = vld [vmem:[%s1854_s25 + $0x318] sm:$0xff] }
  0xd1   : > { %1257 = vmatprep.subr.bf16.mxu0 %v1256_v62  ;;  %v1129_v62 = vld [vmem:[%s1854_s25 + $0x1c0] sm:$0xff] }
  0xd2   : > { %v1330_v2 = vpack.c.bf16 %v1131_v63, %v1129_v62  ;;  %v1171_v62 = vld [vmem:[%s1854_s25 + $0x310] sm:$0xff]  ;;  %v1174_v63 = vld [vmem:[%s1854_s25 + $0x328] sm:$0xff] }
  0xd8   : > { %1259 = vmatpush1.bf16.xpose.msra.mxu0 %v1258_v3  ;;  %v1332_v3 = vpack.c.bf16 %v1136_v1, %v1134_v0  ;;  %v1176_v0 = vld [vmem:[%s1854_s25 + $0x338] sm:$0xff] }
  0xd9   : > { %1261 = vmatprep.subr.bf16.mxu0 %v1260_v4  ;;  %v1133_v4 = vld [vmem:[%s1854_s25 + $0x1e0] sm:$0xff] }
  0xda   : > { %v1334_v8 = vpack.c.bf16 %v1135_v5, %v1133_v4  ;;  %v1173_v4 = vld [vmem:[%s1854_s25 + $0x320] sm:$0xff]  ;;  %v1175_v5 = vld [vmem:[%s1854_s25 + $0x330] sm:$0xff] }
  0xe0   : > { %1263 = vmatpush1.bf16.xpose.msra.mxu0 %v1262_v9  ;;  %v1336_v9 = vpack.c.bf16 %v1140_v7, %v1138_v6  ;;  %v1178_v6 = vld [vmem:[%s1854_s25 + $0x348] sm:$0xff]  ;;  %v1180_v7 = vld [vmem:[%s1854_s25 + $0x358] sm:$0xff] }
  0xe1   : > { %1265 = vmatprep.subr.bf16.mxu0 %v1264_v10  ;;  %v1137_v10 = vld [vmem:[%s1854_s25 + $0x200] sm:$0xff] }
  0xe2   : > { %v1338_v14 = vpack.c.bf16 %v1139_v11, %v1137_v10  ;;  %v1177_v10 = vld [vmem:[%s1854_s25 + $0x340] sm:$0xff]  ;;  %v1179_v11 = vld [vmem:[%s1854_s25 + $0x350] sm:$0xff] }
  0xe8   : > { %1267 = vmatpush1.bf16.xpose.msra.mxu0 %v1266_v16 }
  0xe9   : > { %1269 = vmatprep.subr.bf16.mxu0 %v1268_v17  ;;  %v1340_v17 = vpack.c.bf16 %v1144_v13, %v1142_v12  ;;  %v1182_v12 = vld [vmem:[%s1854_s25 + $0x368] sm:$0xff]  ;;  %v1184_v13 = vld [vmem:[%s1854_s25 + $0x378] sm:$0xff] }
  0xf0   : > { %1271 = vmatpush1.bf16.xpose.msra.mxu0 %v1270_v20  ;;  %v1146_v20 = vld [vmem:[%s1854_s25 + $0x248] sm:$0xff] }
  0xf1   : > { %v1344_v23 = vpack.c.bf16 %v1148_v21, %v1146_v20 }
  0xf7   : > { %469 = vmatmul.mubr.f32.vlgmr.msra.gmra.mrb[0].mxu0 %v263_v40  ;;  %v1115_v40 = vld [vmem:[%s1854_s25 + $0x150] sm:$0xff] }
  0xf8   : > { %v1314_v43 = vpack.c.bf16 %v1115_v40, %v1113_v39  ;;  %v1155_v39 = vld [vmem:[%s1854_s25 + $0x290] sm:$0xff]  ;;  %v1158_v40 = vld [vmem:[%s1854_s25 + $0x2a8] sm:$0xff] }
 0x1ca   : > { %v1906_v33 = vpop.f32.mrb[0].mxu0 }
 0x1cb   : > { %v472_v36 = vpop.f32.mrb[1].mxu0  ;;  %572 = vmatmul.mubr.f32.vlgmr.msra.gmra.mrb[0].mxu1 %v1906_v33  ;;  %v631_v16 = vrot.slane %v1906_v33, 1 }
 0x1cc   : > { %1307 = vmatpush1.bf16.msra.mxu1 %v1306_v29  ;;  %697 = vmatprep.mubr.f32.mxu1 %v1646_v24  ;;  %v1346_v29 = vpack.c.bf16 %v1147_v26, %v1145_v25  ;;  %v1350_v36 = vpack.c.bf16 %v1151_v32, %v1149_v31  ;;  %v1190_v25 = vld [vmem:[%s1854_s25 + $0x3a8] sm:$0xff]  ;;  %v1192_v26 = vld [vmem:[%s1854_s25 + $0x3b8] sm:$0xff] }
 0x1cd   : > { %1309 = vmatprep.subr.bf16.mxu1 %v1308_v30  ;;  %v1348_v30 = vpack.c.bf16 %v1152_v28, %v1150_v27  ;;  %v1388_v28 = vpack.c.bf16 %v1192_v26, %v1190_v25  ;;  %v1194_v31 = vld [vmem:[%s1854_s25 + $0x3c8] sm:$0xff]  ;;  %v1196_v32 = vld [vmem:[%s1854_s25 + $0x3d8] sm:$0xff] }
 0x1d0   : > { %1311 = vmatpush1.bf16.msra.mxu1 %v1310_v37  ;;  %v1352_v37 = vpack.c.bf16 %v1156_v35, %v1154_v34  ;;  %v1392_v35 = vpack.c.bf16 %v1196_v32, %v1194_v31 }
 0x1d1   : > { %1313 = vmatprep.subr.bf16.mxu1 %v1312_v38  ;;  %v1153_v38 = vld [vmem:[%s1854_s25 + $0x280] sm:$0xff] }
 0x1d2   : > { %v1354_v42 = vpack.c.bf16 %v1155_v39, %v1153_v38  ;;  %v1198_v38 = vld [vmem:[%s1854_s25 + $0x3e8] sm:$0xff]  ;;  %v1200_v39 = vld [vmem:[%s1854_s25 + $0x3f8] sm:$0xff] }
 0x1d4   : > { %1315 = vmatpush1.bf16.msra.mxu1 %v1314_v43  ;;  %v1356_v43 = vpack.c.bf16 %v1160_v41, %v1158_v40  ;;  %v1396_v41 = vpack.c.bf16 %v1200_v39, %v1198_v38 }
 0x1d5   : > { %1317 = vmatprep.subr.bf16.mxu1 %v1316_v44  ;;  %v1157_v44 = vld [vmem:[%s1854_s25 + $0x2a0] sm:$0xff] }
 0x1d6   : > { %v1358_v48 = vpack.c.bf16 %v1159_v45, %v1157_v44  ;;  %v881_v45 = vrot.slane %v1906_v33, 3 }
 0x1d8   : > { %1319 = vmatpush1.bf16.msra.mxu1 %v1318_v49  ;;  %v1360_v49 = vpack.c.bf16 %v1164_v47, %v1162_v46 }
 0x1d9   : > { %1321 = vmatprep.subr.bf16.mxu1 %v1320_v50  ;;  %v1161_v50 = vld [vmem:[%s1854_s25 + $0x2c0] sm:$0xff] }
 0x1da   : > { %v1362_v54 = vpack.c.bf16 %v1163_v51, %v1161_v50  ;;  %v584_v51 = vlaneseq }
 0x1dc   : > { %1323 = vmatpush1.bf16.msra.mxu1 %v1322_v55  ;;  %v1364_v55 = vpack.c.bf16 %v1168_v53, %v1166_v52  ;;  %v585_v53 = vshrl.u32 %v584_v51, 7  ;;  %vm975_vm0 = vcmp.lt.s32.totalorder %v584_v51, 256 }
 0x1dd   : > { %1325 = vmatprep.subr.bf16.mxu1 %v1324_v56  ;;  %v1165_v56 = vld [vmem:[%s1854_s25 + $0x2e0] sm:$0xff] }
 0x1de   : > { %v1366_v59 = vpack.c.bf16 %v1167_v57, %v1165_v56 }
 0x1e0   : > { %1327 = vmatpush1.bf16.msra.mxu1 %v1326_v60  ;;  %v1368_v60 = vpack.c.bf16 %v1172_v58, %v1170_v15  ;;  %v474_v58 = vld [vmem:[%s259_s11] sm:$0x3] }
 0x1e1   : > { %1329 = vmatprep.subr.bf16.mxu1 %v1328_v61  ;;  %v1169_v61 = vld [vmem:[%s1854_s25 + $0x300] sm:$0xff] }
 0x1e2   : > { %v1370_v1 = vpack.c.bf16 %v1171_v62, %v1169_v61 }
 0x1e4   : > { %1331 = vmatpush1.bf16.msra.mxu1 %v1330_v2  ;;  %v756_v2 = vrot.slane %v1906_v33, 2 }
 0x1e5   : > { %1333 = vmatprep.subr.bf16.mxu1 %v1332_v3  ;;  %v1372_v3 = vpack.c.bf16 %v1176_v0, %v1174_v63 }
 0x1e8   : > { %1335 = vmatpush1.bf16.msra.mxu1 %v1334_v8  ;;  %v1374_v8 = vpack.c.bf16 %v1175_v5, %v1173_v4 }
 0x1e9   : > { %1337 = vmatprep.subr.bf16.mxu1 %v1336_v9  ;;  %v1376_v9 = vpack.c.bf16 %v1180_v7, %v1178_v6 }
 0x1eb   : > { %698 = vmatmul.mubr.f32.vlgmr.msra.gmra.mrb[2].mxu1 %v631_v16  ;;  %v1380_v16 = vpack.c.bf16 %v1184_v13, %v1182_v12 }
 0x1ec   : > { %1339 = vmatpush1.bf16.msra.mxu1 %v1338_v14  ;;  %822 = vmatprep.mubr.f32.mxu1 %v1646_v24  ;;  %v1378_v14 = vpack.c.bf16 %v1179_v11, %v1177_v10 }
 0x1ed   : > { %1341 = vmatprep.subr.bf16.mxu1 %v1340_v17  ;;  %v1181_v17 = vld [vmem:[%s1854_s25 + $0x360] sm:$0xff] }
 0x1ee   : > { %v1382_v20 = vpack.c.bf16 %v1183_v18, %v1181_v17 }
 0x1f0   : > { %1343 = vmatpush1.bf16.msra.mxu1 %v1342_v22  ;;  %v1185_v22 = vld [vmem:[%s1854_s25 + $0x380] sm:$0xff] }
 0x1f1   : > { %1345 = vmatprep.subr.bf16.mxu1 %v1344_v23  ;;  %v1187_v23 = vld [vmem:[%s1854_s25 + $0x390] sm:$0xff] }
 0x1f2   : > { %v1386_v27 = vpack.c.bf16 %v1187_v23, %v1185_v22 }
 0x1f4   : > { %1347 = vmatpush1.bf16.msra.mxu1 %v1346_v29  ;;  %v1189_v29 = vld [vmem:[%s1854_s25 + $0x3a0] sm:$0xff] }
 0x1f5   : > { %1349 = vmatprep.subr.bf16.mxu1 %v1348_v30  ;;  %v1191_v30 = vld [vmem:[%s1854_s25 + $0x3b0] sm:$0xff] }
 0x1f6   : > { %v1390_v34 = vpack.c.bf16 %v1191_v30, %v1189_v29 }
 0x1f8   : > { %1351 = vmatpush1.bf16.msra.mxu1 %v1350_v36  ;;  %v1193_v36 = vld [vmem:[%s1854_s25 + $0x3c0] sm:$0xff] }
 0x1f9   : > { %1353 = vmatprep.subr.bf16.mxu1 %v1352_v37  ;;  %v1195_v37 = vld [vmem:[%s1854_s25 + $0x3d0] sm:$0xff] }
 0x1fa   : > { %v1394_v40 = vpack.c.bf16 %v1195_v37, %v1193_v36 }
 0x1fc   : > { %1355 = vmatpush1.bf16.msra.mxu1 %v1354_v42  ;;  %v1197_v42 = vld [vmem:[%s1854_s25 + $0x3e0] sm:$0xff] }
 0x1fd   : > { %1357 = vmatprep.subr.bf16.mxu1 %v1356_v43  ;;  %v1199_v43 = vld [vmem:[%s1854_s25 + $0x3f0] sm:$0xff] }
 0x1fe   : > { %v1398_v44 = vpack.c.bf16 %v1199_v43, %v1197_v42 }
 0x200   : > { %1359 = vmatpush1.bf16.msra.mxu1 %v1358_v48 }
 0x201   : > { %1361 = vmatprep.subr.bf16.mxu1 %v1360_v49  ;;  %v1647_v49 = vmov 1966171168  }
 0x202   : > { %v582_v50 = vunpack.c.l.s4 %v1647_v49 }
 0x204   : > { %1363 = vmatpush1.bf16.msra.mxu1 %v1362_v54  ;;  %v583_v52 = vunpack.c.0.s8 %v582_v50 }
 0x205   : > { %1365 = vmatprep.subr.bf16.mxu1 %v1364_v55 }
 0x206   : > { %v586_v54 = vsub.s32 %v583_v52, %v585_v53 }
 0x208   : > { %1367 = vmatpush1.bf16.msra.mxu1 %v1366_v59 }
 0x209   : > { %1369 = vmatprep.subr.bf16.mxu1 %v1368_v60 }
 0x20b   : > { %823 = vmatmul.mubr.f32.vlgmr.msra.gmra.mrb[4].mxu1 %v756_v2 }
 0x20c   : > { %1371 = vmatpush1.bf16.msra.mxu1 %v1370_v1  ;;  %947 = vmatprep.mubr.f32.mxu1 %v1646_v24  ;;  %v1188_v24 = vld [vmem:[%s1854_s25 + $0x398] sm:$0xff] }
 0x20d   : > { %1373 = vmatprep.subr.bf16.mxu1 %v1372_v3  ;;  %v1384_v21 = vpack.c.bf16 %v1188_v24, %v1186_v19 }
 0x210   : > { %1375 = vmatpush1.bf16.msra.mxu1 %v1374_v8 }
 0x211   : > { %1377 = vmatprep.subr.bf16.mxu1 %v1376_v9 }
 0x214   : > { %1379 = vmatpush1.bf16.msra.mxu1 %v1378_v14 }
 0x215   : > { %1381 = vmatprep.subr.bf16.mxu1 %v1380_v16 }
 0x218   : > { %1383 = vmatpush1.bf16.msra.mxu1 %v1382_v20 }
 0x219   : > { %1385 = vmatprep.subr.bf16.mxu1 %v1384_v21 }
 0x21c   : > { %1387 = vmatpush1.bf16.msra.mxu1 %v1386_v27 }
 0x21d   : > { %1389 = vmatprep.subr.bf16.mxu1 %v1388_v28 }
 0x220   : > { %1391 = vmatpush1.bf16.msra.mxu1 %v1390_v34 }
 0x221   : > { %1393 = vmatprep.subr.bf16.mxu1 %v1392_v35 }
 0x224   : > { %1395 = vmatpush1.bf16.msra.mxu1 %v1394_v40 }
 0x225   : > { %1397 = vmatprep.subr.bf16.mxu1 %v1396_v41 }
 0x228   : > { %1399 = vmatpush1.bf16.msra.mxu1 %v1398_v44 }
 0x22b   : > { %948 = vmatmul.mubr.f32.vlgmr.msra.gmra.mrb[6].mxu1 %v881_v45 }
 0x29e   : > { %v573_v46 = vpop.f32.mrb[0].mxu1 }
 0x29f   : > { %v575_v47 = vpop.f32.mrb[1].mxu1 }
 0x2a0   : > { %v580_v48 = vcombine.low %v573_v46, %v575_v47 }
 0x2a2   : > { %v587_v55 = vrot.slane %v580_v48, %v586_v54 }
 0x2a4   : > { %v594_v57 = vrot.slane %v587_v55, %v586_v54 }
 0x2a6   : > { %v596_v60 = vadd.f32 %v594_v57, %v474_v58 }
 0x2be   : > { %v699_v33 = vpop.f32.mrb[2].mxu1 }
 0x2bf   : > { %v701_v56 = vpop.f32.mrb[3].mxu1 }
 0x2c0   : > { %v706_v15 = vcombine.low %v699_v33, %v701_v56 }
 0x2c2   : > { %v713_v59 = vrot.slane %v706_v15, %v586_v54 }
 0x2c4   : > { %v720_v61 = vrot.slane %v713_v59, %v586_v54 }
 0x2c6   : > { %v722_v62 = vadd.f32 %v720_v61, %v596_v60 }
 0x2de   : > { %v824_v63 = vpop.f32.mrb[4].mxu1 }
 0x2df   : > { %v826_v0 = vpop.f32.mrb[5].mxu1 }
 0x2e0   : > { %v831_v1 = vcombine.low %v824_v63, %v826_v0 }
 0x2e2   : > { %v838_v2 = vrot.slane %v831_v1, %v586_v54 }
 0x2e4   : > { %v845_v3 = vrot.slane %v838_v2, %v586_v54 }
 0x2e6   : > { %v847_v4 = vadd.f32 %v845_v3, %v722_v62 }
 0x2fe   : > { %v949_v5 = vpop.f32.mrb[6].mxu1 }
 0x2ff   : > { %v951_v6 = vpop.f32.mrb[7].mxu1 }
 0x300   : > { %v956_v7 = vcombine.low %v949_v5, %v951_v6 }
 0x302   : > { %v963_v8 = vrot.slane %v956_v7, %v586_v54 }
 0x304   : > { %v970_v9 = vrot.slane %v963_v8, %v586_v54 }
 0x306   : > { %v972_v10 = vadd.f32 %v970_v9, %v847_v4 }
 0x308   : > { %977 = vst.msk [vmem:[%s254_s9] sm:$0x3] %vm975_vm0, %v972_v10 }
 0x309   : > { %1576 = shalt.err (!%p1573_p3)
}
 0x30a   : > { %s1577_s23 = scalar_lea.hbm %s2012_s8, 32  ;;  %s1581_s22 = scalar_lea.hbm %s2060_s4, 64 }
 0x30b   : > { %p1578_p6 = scmp.ne.s32.totalorder %s2012_s8, %s1577_s23  ;;  %p1582_p9 = scmp.lt.u32.totalorder %s2012_s8, %s2060_s4 }
 0x30c   : > { %p1583_p8 = scmp.lt.u32.totalorder %s1581_s22, %s1577_s23  ;;  %p1585_p1 = scmp.lt.u32.totalorder %s1577_s23, %s2012_s8 }
 0x30d   : > { %p1579_p13 = pnand %p1578_p6, %p2082_p4 }
 0x30e   : > { %p1584_p10 = por %p1583_p8, %p1582_p9 }
 0x30f   : > { %p1580_p7 = pneg %p1579_p13 }
 0x310   : > { %p1586_p0 = por %p1585_p1, %p1584_p10 }
 0x312   : > { %p1587_p2 = pnand %p1586_p0, %p1580_p7 }
 0x314   : > { %1590 = shalt.err (!%p1587_p2)
}
 0x315   : > { %1412 = dma.vmem_to_hbm [thread:$0]  (%p2082_p4), %s2014_s12, 32, %s2012_s8, %s979_s30  }
 0x316 PF: > { %s1005_s13 = sand.u32 1, %s1625_s15   ;;  %p2083_p5 = scmp.ne.s32.totalorder %s2069_s28, 0 }
 0x317   : > { %p2084_p11 = scmp.ge.s32.totalorder %s1637_s18, 2  ;;  %s1006_s14 = scalar_lea.sflag [#allocation4], %s1005_s13 }
 0x319   : > { %p1426_p12 = pnand %p2084_p11, %p2083_p5 }
 0x31b   : > { %1620 = dma.done.wait (!%p1426_p12), %s1006_s14, 32  }
 0x31c   : > { %1622 = vsyncadd (!%p1426_p12), %s1006_s14, 4294967264  ;;  %p16_p3 = scmp.ge.s32.totalorder %s1699_s21, 4   ;;  %s2085_s15 = smov %s1629_s16 }
 0x31d   : > { %s2086_s16 = smov %s1633_s17  ;;  %s2087_s17 = smov %s1711_s24 }
 0x31e   : > { %s2088_s18 = smov %s1699_s21  ;;  %18 = sbr.rel (!%p16_p3) target bundleno = 5 (0x5), region = 94 }
 0x325   :  { %1011 = vsyncpa [#allocation3], 1 }
 0x326   :  { %1013 = vsyncpa [#allocation3 + $0x1], 1 }
 0x327   :  { %1014 = vsyncpa [#allocation6], 1 }
 0x328   :  { %1015 = vsyncpa [#allocation4], 1 }
 0x329   :  { %1017 = vsyncpa [#allocation4 + $0x1], 1 }

</bundles_post_ra>
